<compile_context>
chip_gen: v6e
topology: v6e:2x2x1
jax: 0.10.0
libtpu: 0.0.40
codegen_flags: <defaults>
</compile_context>

<pallas_src>
import functools

import jax
import jax.numpy as jnp
from jax.experimental import pallas as pl
from jax.experimental.pallas import tpu as pltpu


# ----------------------------------------------------------------------------
# Fused Pallas kernel: all RNN layers (both directions) + FC + sigmoid
# ----------------------------------------------------------------------------
def _fused_rnn_fc_kernel(*refs, num_layers, hidden_size, seq_len, batch):
    """Refs layout:
       refs[0]                      x          (T*B, D_in)  time-major rows r = t*B + b
       per layer l (3 refs each):   w_ih_cat   (d_in_l, 2H)  [fwd | bwd] along output dim
                                    w_hh_cat   (2H, 2H)      block-diag(w_hh_f, w_hh_b)
                                    b_cat      (1, 2H)       [b_ih_f+b_hh_f | b_ih_b+b_hh_b]
       then:                        fc_w_cat   (1, 2H)
                                    fc_b       (1, 1)
       output:                      out        (T*B, 1)
    """
    H, T, B = hidden_size, seq_len, batch
    H2 = 2 * H
    f32 = jnp.float32

    n_l = 3 * num_layers
    x_ref = refs[0]
    layer_refs = refs[1:1 + n_l]
    fc_w_ref = refs[1 + n_l]
    fc_b_ref = refs[2 + n_l]
    out_ref = refs[3 + n_l]

    feats = x_ref[...]                                        # (T*B, D_in)

    for l in range(num_layers):
        w_ih = layer_refs[3 * l + 0][...]                     # (d_in_l, 2H)
        w_hh = layer_refs[3 * l + 1][...]                     # (2H, 2H) block-diag
        bias = layer_refs[3 * l + 2][...]                     # (1, 2H)

        # ---- hoisted input projection for BOTH directions: one MXU matmul
        # over all T*B rows, off the serial dependence chain.
        proj = jnp.dot(feats, w_ih, preferred_element_type=f32) + bias   # (T*B, 2H)

        # ---- pre-split per-step operands (backward half time-reversed) so
        # the dependent loop does no sublane extraction.
        step_in = []
        for i in range(T):
            tb = T - 1 - i
            step_in.append(jnp.concatenate(
                [proj[i * B:(i + 1) * B, 0:H],        # fwd input at time i
                 proj[tb * B:(tb + 1) * B, H:H2]],    # bwd input at time T-1-i
                axis=1))                              # (B, 2H)

        # ---- fused fwd/bwd recurrence, fully unrolled (static T):
        # one (B, 2H) @ (2H, 2H) matmul + relu per step.
        h = jnp.zeros((B, H2), f32)
        hs = []
        for i in range(T):
            h = jnp.maximum(
                step_in[i] + jnp.dot(h, w_hh, preferred_element_type=f32), 0.0)
            hs.append(h)                              # [hf at t=i | hb at t=T-1-i]

        # ---- re-assemble time-aligned [fwd | bwd] activations as a value
        # (no VMEM scratch): act[t] = [hf_t | hb_t].
        acts = []
        for t in range(T):
            acts.append(jnp.concatenate(
                [hs[t][:, 0:H], hs[T - 1 - t][:, H:H2]], axis=1))
        feats = jnp.concatenate(acts, axis=0)         # (T*B, 2H)

    # ---- final FC: one VPU multiply + one lane reduce, then sigmoid + NaN mask.
    y = jnp.sum(feats * fc_w_ref[...], axis=1, keepdims=True) + fc_b_ref[...]  # (T*B, 1)
    s = 1.0 / (1.0 + jnp.exp(-y))   # exp -> EUP; exact divide keeps parity with ref
    # torch.nan_to_num also clamps +/-inf, but sigmoid output is bounded in
    # [0, 1] for any finite/inf input, so only NaN needs replacing here.
    out_ref[...] = jnp.where(jnp.isnan(s), 0.0, s)


# ----------------------------------------------------------------------------
# Wrapper
# ----------------------------------------------------------------------------
_VMEM_SPEC = pl.BlockSpec(memory_space=pltpu.MemorySpace.VMEM)


def recreated_model_forward(x, params, fc_w_f, fc_w_b, fc_b):
    """x: (B, T, input_size) float32 (batch_first, like the PyTorch module)."""
    B, T, D = x.shape
    num_layers = len(params)
    H = params[0]["w_hh_f"].shape[0]
    H2 = 2 * H

    # tiny layout-only op (B*T*D = 64 floats); fuses under jit
    x_tm = jnp.transpose(x, (1, 0, 2)).reshape(T * B, D)   # rows r = t*B + b

    # ---- one-time wrapper-side weight packing (lane-concat + block-diag)
    zero = jnp.zeros((H, H), jnp.float32)
    inputs = [x_tm]
    for layer in params:
        w_ih_cat = jnp.concatenate([layer["w_ih_f"], layer["w_ih_b"]], axis=1)
        w_hh_cat = jnp.concatenate(
            [jnp.concatenate([layer["w_hh_f"], zero], axis=1),
             jnp.concatenate([zero, layer["w_hh_b"]], axis=1)], axis=0)
        b_cat = jnp.concatenate([layer["b_f"], layer["b_b"]], axis=1)
        inputs += [w_ih_cat, w_hh_cat, b_cat]
    fc_w_cat = jnp.concatenate([fc_w_f, fc_w_b], axis=1)
    inputs += [fc_w_cat, fc_b]

    # advisory cost estimate for XLA scheduling
    flops = 0
    d_in = D
    for _ in range(num_layers):
        flops += 2 * (T * B) * d_in * H2        # hoisted input projection
        flops += T * 2 * B * H2 * H2            # recurrent matmuls
        d_in = H2
    flops += 2 * (T * B) * H2                   # final FC
    bytes_accessed = 4 * (sum(int(a.size) for a in inputs) + T * B)

    kernel = functools.partial(
        _fused_rnn_fc_kernel,
        num_layers=num_layers, hidden_size=H, seq_len=T, batch=B)

    out = pl.pallas_call(
        kernel,
        out_shape=jax.ShapeDtypeStruct((T * B, 1), jnp.float32),
        in_specs=[_VMEM_SPEC] * len(inputs),
        out_specs=_VMEM_SPEC,
        cost_estimate=pl.CostEstimate(flops=flops, transcendentals=T * B,
                                      bytes_accessed=bytes_accessed),
    )(*inputs)

    # (T*B, 1) time-major -> (B, T) batch_first (16 floats; fuses under jit)
    return jnp.transpose(out.reshape(T, B))


# ----------------------------------------------------------------------------
# Deterministic parameter init (matches nn.RNN / nn.Linear shapes, transposed)
# ----------------------------------------------------------------------------
def init_params(key, input_size, hidden_size, num_layers):
    H = hidden_size
    bound = 1.0 / jnp.sqrt(jnp.float32(H))
    params = []
    for l in range(num_layers):
        d_in = input_size if l == 0 else 2 * H
        key, *ks = jax.random.split(key, 9)
        params.append(dict(
            w_ih_f=jax.random.uniform(ks[0], (d_in, H), jnp.float32, -bound, bound),
            w_hh_f=jax.random.uniform(ks[1], (H, H), jnp.float32, -bound, bound),
            b_f=(jax.random.uniform(ks[2], (1, H), jnp.float32, -bound, bound)
                 + jax.random.uniform(ks[3], (1, H), jnp.float32, -bound, bound)),
            w_ih_b=jax.random.uniform(ks[4], (d_in, H), jnp.float32, -bound, bound),
            w_hh_b=jax.random.uniform(ks[5], (H, H), jnp.float32, -bound, bound),
            b_b=(jax.random.uniform(ks[6], (1, H), jnp.float32, -bound, bound)
                 + jax.random.uniform(ks[7], (1, H), jnp.float32, -bound, bound)),
        ))
    key, k1, k2, k3 = jax.random.split(key, 4)
    fb = 1.0 / jnp.sqrt(jnp.float32(2 * H))
    fc_w_f = jax.random.uniform(k1, (1, H), jnp.float32, -fb, fb)
    fc_w_b = jax.random.uniform(k2, (1, H), jnp.float32, -fb, fb)
    fc_b = jax.random.uniform(k3, (1, 1), jnp.float32, -fb, fb)
    return params, fc_w_f, fc_w_b, fc_b


# ----------------------------------------------------------------------------
# Pure-JAX reference (same math, no Pallas) for a correctness check
# ----------------------------------------------------------------------------
def reference_forward(x, params, fc_w_f, fc_w_b, fc_b):
    B, T, _ = x.shape
    feats = x
    for layer in params:
        H = layer["w_hh_f"].shape[0]
        outs = {}
        for name, reverse in (("f", False), ("b", True)):
            w_ih = layer[f"w_ih_{name}"]
            w_hh = layer[f"w_hh_{name}"]
            bias = layer[f"b_{name}"]
            h = jnp.zeros((B, H), jnp.float32)
            buf = [None] * T
            ts = range(T - 1, -1, -1) if reverse else range(T)
            for t in ts:
                h = jnp.maximum(feats[:, t, :] @ w_ih + h @ w_hh + bias, 0.0)
                buf[t] = h
            outs[name] = jnp.stack(buf, axis=1)                 # (B, T, H)
        feats = jnp.concatenate([outs["f"], outs["b"]], axis=-1)  # (B, T, 2H)
    fc_w = jnp.concatenate([fc_w_f, fc_w_b], axis=1)            # (1, 2H)
    y = jnp.einsum("btk,k->bt", feats, fc_w[0]) + fc_b[0, 0]
    s = 1.0 / (1.0 + jnp.exp(-y))
    return jnp.nan_to_num(s)


# ----------------------------------------------------------------------------
if __name__ == "__main__":
    BATCH, SEQ, INPUT_SIZE, HIDDEN, NUM_LAYERS = 2, 8, 4, 32, 2

    key = jax.random.PRNGKey(0)
    key, kx, kp = jax.random.split(key, 3)
    x = jax.random.normal(kx, (BATCH, SEQ, INPUT_SIZE), jnp.float32)
    params, fc_w_f, fc_w_b, fc_b = init_params(kp, INPUT_SIZE, HIDDEN, NUM_LAYERS)

    fwd = jax.jit(recreated_model_forward)
    out = jax.block_until_ready(fwd(x, params, fc_w_f, fc_w_b, fc_b))
    ref = jax.block_until_ready(reference_forward(x, params, fc_w_f, fc_w_b, fc_b))

    assert out.shape == (BATCH, SEQ), out.shape
    assert bool(jnp.allclose(out, ref, atol=2e-5, rtol=2e-5)), "mismatch vs reference"

    print("KERNEL_OK")
</pallas_src>

<mosaic_0001>
module attributes {stable_mosaic.version = 11 : i64} {
  func.func @_fused_rnn_fc_kernel(%arg0: memref<16x4xf32, #tpu.memory_space<vmem>>, %arg1: memref<4x64xf32, #tpu.memory_space<vmem>>, %arg2: memref<64x64xf32, #tpu.memory_space<vmem>>, %arg3: memref<1x64xf32, #tpu.memory_space<vmem>>, %arg4: memref<64x64xf32, #tpu.memory_space<vmem>>, %arg5: memref<64x64xf32, #tpu.memory_space<vmem>>, %arg6: memref<1x64xf32, #tpu.memory_space<vmem>>, %arg7: memref<1x64xf32, #tpu.memory_space<vmem>>, %arg8: memref<1x1xf32, #tpu.memory_space<vmem>>, %arg9: memref<16x1xf32, #tpu.memory_space<vmem>>) attributes {dimension_semantics = [], scalar_prefetch = 0 : i64, scratch_operands = 0 : i64, tpu.core_type = #tpu.core_type<tc>} {
    %c0 = arith.constant 0 : index
    %c0_0 = arith.constant 0 : index
    %0 = vector.load %arg0[%c0, %c0_0] : memref<16x4xf32, #tpu.memory_space<vmem>>, vector<16x4xf32>
    %c0_1 = arith.constant 0 : index
    %c0_2 = arith.constant 0 : index
    %1 = vector.load %arg1[%c0_1, %c0_2] : memref<4x64xf32, #tpu.memory_space<vmem>>, vector<4x64xf32>
    %c0_3 = arith.constant 0 : index
    %c0_4 = arith.constant 0 : index
    %2 = vector.load %arg2[%c0_3, %c0_4] : memref<64x64xf32, #tpu.memory_space<vmem>>, vector<64x64xf32>
    %c0_5 = arith.constant 0 : index
    %c0_6 = arith.constant 0 : index
    %3 = vector.load %arg3[%c0_5, %c0_6] : memref<1x64xf32, #tpu.memory_space<vmem>>, vector<1x64xf32>
    %cst = arith.constant dense<0.000000e+00> : vector<16x64xf32>
    %4 = tpu.matmul %0, %1, %cst {dimension_numbers = #tpu.dot_dimension_numbers<[1], [0], [0], [1], [0, 0, 1, 1], [], []>} : vector<16x4xf32>, vector<4x64xf32>, vector<16x64xf32> -> vector<16x64xf32>
    %5 = vector.broadcast %3 : vector<1x64xf32> to vector<16x64xf32>
    %6 = arith.addf %4, %5 : vector<16x64xf32>
    %7 = vector.extract_strided_slice %6 {offsets = [0, 0], sizes = [2, 32], strides = [1, 1]} : vector<16x64xf32> to vector<2x32xf32>
    %8 = vector.extract_strided_slice %6 {offsets = [14, 32], sizes = [2, 32], strides = [1, 1]} : vector<16x64xf32> to vector<2x32xf32>
    %9 = tpu.concatenate %7, %8 in 1 : vector<2x32xf32>, vector<2x32xf32> -> vector<2x64xf32>
    %10 = vector.extract_strided_slice %6 {offsets = [2, 0], sizes = [2, 32], strides = [1, 1]} : vector<16x64xf32> to vector<2x32xf32>
    %11 = vector.extract_strided_slice %6 {offsets = [12, 32], sizes = [2, 32], strides = [1, 1]} : vector<16x64xf32> to vector<2x32xf32>
    %12 = tpu.concatenate %10, %11 in 1 : vector<2x32xf32>, vector<2x32xf32> -> vector<2x64xf32>
    %13 = vector.extract_strided_slice %6 {offsets = [4, 0], sizes = [2, 32], strides = [1, 1]} : vector<16x64xf32> to vector<2x32xf32>
    %14 = vector.extract_strided_slice %6 {offsets = [10, 32], sizes = [2, 32], strides = [1, 1]} : vector<16x64xf32> to vector<2x32xf32>
    %15 = tpu.concatenate %13, %14 in 1 : vector<2x32xf32>, vector<2x32xf32> -> vector<2x64xf32>
    %16 = vector.extract_strided_slice %6 {offsets = [6, 0], sizes = [2, 32], strides = [1, 1]} : vector<16x64xf32> to vector<2x32xf32>
    %17 = vector.extract_strided_slice %6 {offsets = [8, 32], sizes = [2, 32], strides = [1, 1]} : vector<16x64xf32> to vector<2x32xf32>
    %18 = tpu.concatenate %16, %17 in 1 : vector<2x32xf32>, vector<2x32xf32> -> vector<2x64xf32>
    %19 = vector.extract_strided_slice %6 {offsets = [8, 0], sizes = [2, 32], strides = [1, 1]} : vector<16x64xf32> to vector<2x32xf32>
    %20 = vector.extract_strided_slice %6 {offsets = [6, 32], sizes = [2, 32], strides = [1, 1]} : vector<16x64xf32> to vector<2x32xf32>
    %21 = tpu.concatenate %19, %20 in 1 : vector<2x32xf32>, vector<2x32xf32> -> vector<2x64xf32>
    %22 = vector.extract_strided_slice %6 {offsets = [10, 0], sizes = [2, 32], strides = [1, 1]} : vector<16x64xf32> to vector<2x32xf32>
    %23 = vector.extract_strided_slice %6 {offsets = [4, 32], sizes = [2, 32], strides = [1, 1]} : vector<16x64xf32> to vector<2x32xf32>
    %24 = tpu.concatenate %22, %23 in 1 : vector<2x32xf32>, vector<2x32xf32> -> vector<2x64xf32>
    %25 = vector.extract_strided_slice %6 {offsets = [12, 0], sizes = [2, 32], strides = [1, 1]} : vector<16x64xf32> to vector<2x32xf32>
    %26 = vector.extract_strided_slice %6 {offsets = [2, 32], sizes = [2, 32], strides = [1, 1]} : vector<16x64xf32> to vector<2x32xf32>
    %27 = tpu.concatenate %25, %26 in 1 : vector<2x32xf32>, vector<2x32xf32> -> vector<2x64xf32>
    %28 = vector.extract_strided_slice %6 {offsets = [14, 0], sizes = [2, 32], strides = [1, 1]} : vector<16x64xf32> to vector<2x32xf32>
    %29 = vector.extract_strided_slice %6 {offsets = [0, 32], sizes = [2, 32], strides = [1, 1]} : vector<16x64xf32> to vector<2x32xf32>
    %30 = tpu.concatenate %28, %29 in 1 : vector<2x32xf32>, vector<2x32xf32> -> vector<2x64xf32>
    %cst_7 = arith.constant 0.000000e+00 : f32
    %31 = vector.broadcast %cst_7 : f32 to vector<2x64xf32>
    %cst_8 = arith.constant dense<0.000000e+00> : vector<2x64xf32>
    %32 = tpu.matmul %31, %2, %cst_8 {dimension_numbers = #tpu.dot_dimension_numbers<[1], [0], [0], [1], [0, 0, 1, 1], [], []>} : vector<2x64xf32>, vector<64x64xf32>, vector<2x64xf32> -> vector<2x64xf32>
    %33 = arith.addf %9, %32 : vector<2x64xf32>
    %cst_9 = arith.constant 0.000000e+00 : f32
    %34 = vector.broadcast %cst_9 : f32 to vector<2x64xf32>
    %35 = arith.maximumf %33, %34 : vector<2x64xf32>
    %cst_10 = arith.constant dense<0.000000e+00> : vector<2x64xf32>
    %36 = tpu.matmul %35, %2, %cst_10 {dimension_numbers = #tpu.dot_dimension_numbers<[1], [0], [0], [1], [0, 0, 1, 1], [], []>} : vector<2x64xf32>, vector<64x64xf32>, vector<2x64xf32> -> vector<2x64xf32>
    %37 = arith.addf %12, %36 : vector<2x64xf32>
    %cst_11 = arith.constant 0.000000e+00 : f32
    %38 = vector.broadcast %cst_11 : f32 to vector<2x64xf32>
    %39 = arith.maximumf %37, %38 : vector<2x64xf32>
    %cst_12 = arith.constant dense<0.000000e+00> : vector<2x64xf32>
    %40 = tpu.matmul %39, %2, %cst_12 {dimension_numbers = #tpu.dot_dimension_numbers<[1], [0], [0], [1], [0, 0, 1, 1], [], []>} : vector<2x64xf32>, vector<64x64xf32>, vector<2x64xf32> -> vector<2x64xf32>
    %41 = arith.addf %15, %40 : vector<2x64xf32>
    %cst_13 = arith.constant 0.000000e+00 : f32
    %42 = vector.broadcast %cst_13 : f32 to vector<2x64xf32>
    %43 = arith.maximumf %41, %42 : vector<2x64xf32>
    %cst_14 = arith.constant dense<0.000000e+00> : vector<2x64xf32>
    %44 = tpu.matmul %43, %2, %cst_14 {dimension_numbers = #tpu.dot_dimension_numbers<[1], [0], [0], [1], [0, 0, 1, 1], [], []>} : vector<2x64xf32>, vector<64x64xf32>, vector<2x64xf32> -> vector<2x64xf32>
    %45 = arith.addf %18, %44 : vector<2x64xf32>
    %cst_15 = arith.constant 0.000000e+00 : f32
    %46 = vector.broadcast %cst_15 : f32 to vector<2x64xf32>
    %47 = arith.maximumf %45, %46 : vector<2x64xf32>
    %cst_16 = arith.constant dense<0.000000e+00> : vector<2x64xf32>
    %48 = tpu.matmul %47, %2, %cst_16 {dimension_numbers = #tpu.dot_dimension_numbers<[1], [0], [0], [1], [0, 0, 1, 1], [], []>} : vector<2x64xf32>, vector<64x64xf32>, vector<2x64xf32> -> vector<2x64xf32>
    %49 = arith.addf %21, %48 : vector<2x64xf32>
    %cst_17 = arith.constant 0.000000e+00 : f32
    %50 = vector.broadcast %cst_17 : f32 to vector<2x64xf32>
    %51 = arith.maximumf %49, %50 : vector<2x64xf32>
    %cst_18 = arith.constant dense<0.000000e+00> : vector<2x64xf32>
    %52 = tpu.matmul %51, %2, %cst_18 {dimension_numbers = #tpu.dot_dimension_numbers<[1], [0], [0], [1], [0, 0, 1, 1], [], []>} : vector<2x64xf32>, vector<64x64xf32>, vector<2x64xf32> -> vector<2x64xf32>
    %53 = arith.addf %24, %52 : vector<2x64xf32>
    %cst_19 = arith.constant 0.000000e+00 : f32
    %54 = vector.broadcast %cst_19 : f32 to vector<2x64xf32>
    %55 = arith.maximumf %53, %54 : vector<2x64xf32>
    %cst_20 = arith.constant dense<0.000000e+00> : vector<2x64xf32>
    %56 = tpu.matmul %55, %2, %cst_20 {dimension_numbers = #tpu.dot_dimension_numbers<[1], [0], [0], [1], [0, 0, 1, 1], [], []>} : vector<2x64xf32>, vector<64x64xf32>, vector<2x64xf32> -> vector<2x64xf32>
    %57 = arith.addf %27, %56 : vector<2x64xf32>
    %cst_21 = arith.constant 0.000000e+00 : f32
    %58 = vector.broadcast %cst_21 : f32 to vector<2x64xf32>
    %59 = arith.maximumf %57, %58 : vector<2x64xf32>
    %cst_22 = arith.constant dense<0.000000e+00> : vector<2x64xf32>
    %60 = tpu.matmul %59, %2, %cst_22 {dimension_numbers = #tpu.dot_dimension_numbers<[1], [0], [0], [1], [0, 0, 1, 1], [], []>} : vector<2x64xf32>, vector<64x64xf32>, vector<2x64xf32> -> vector<2x64xf32>
    %61 = arith.addf %30, %60 : vector<2x64xf32>
    %cst_23 = arith.constant 0.000000e+00 : f32
    %62 = vector.broadcast %cst_23 : f32 to vector<2x64xf32>
    %63 = arith.maximumf %61, %62 : vector<2x64xf32>
    %64 = vector.extract_strided_slice %35 {offsets = [0, 0], sizes = [2, 32], strides = [1, 1]} : vector<2x64xf32> to vector<2x32xf32>
    %65 = vector.extract_strided_slice %63 {offsets = [0, 32], sizes = [2, 32], strides = [1, 1]} : vector<2x64xf32> to vector<2x32xf32>
    %66 = tpu.concatenate %64, %65 in 1 : vector<2x32xf32>, vector<2x32xf32> -> vector<2x64xf32>
    %67 = vector.extract_strided_slice %39 {offsets = [0, 0], sizes = [2, 32], strides = [1, 1]} : vector<2x64xf32> to vector<2x32xf32>
    %68 = vector.extract_strided_slice %59 {offsets = [0, 32], sizes = [2, 32], strides = [1, 1]} : vector<2x64xf32> to vector<2x32xf32>
    %69 = tpu.concatenate %67, %68 in 1 : vector<2x32xf32>, vector<2x32xf32> -> vector<2x64xf32>
    %70 = vector.extract_strided_slice %43 {offsets = [0, 0], sizes = [2, 32], strides = [1, 1]} : vector<2x64xf32> to vector<2x32xf32>
    %71 = vector.extract_strided_slice %55 {offsets = [0, 32], sizes = [2, 32], strides = [1, 1]} : vector<2x64xf32> to vector<2x32xf32>
    %72 = tpu.concatenate %70, %71 in 1 : vector<2x32xf32>, vector<2x32xf32> -> vector<2x64xf32>
    %73 = vector.extract_strided_slice %47 {offsets = [0, 0], sizes = [2, 32], strides = [1, 1]} : vector<2x64xf32> to vector<2x32xf32>
    %74 = vector.extract_strided_slice %51 {offsets = [0, 32], sizes = [2, 32], strides = [1, 1]} : vector<2x64xf32> to vector<2x32xf32>
    %75 = tpu.concatenate %73, %74 in 1 : vector<2x32xf32>, vector<2x32xf32> -> vector<2x64xf32>
    %76 = vector.extract_strided_slice %51 {offsets = [0, 0], sizes = [2, 32], strides = [1, 1]} : vector<2x64xf32> to vector<2x32xf32>
    %77 = vector.extract_strided_slice %47 {offsets = [0, 32], sizes = [2, 32], strides = [1, 1]} : vector<2x64xf32> to vector<2x32xf32>
    %78 = tpu.concatenate %76, %77 in 1 : vector<2x32xf32>, vector<2x32xf32> -> vector<2x64xf32>
    %79 = vector.extract_strided_slice %55 {offsets = [0, 0], sizes = [2, 32], strides = [1, 1]} : vector<2x64xf32> to vector<2x32xf32>
    %80 = vector.extract_strided_slice %43 {offsets = [0, 32], sizes = [2, 32], strides = [1, 1]} : vector<2x64xf32> to vector<2x32xf32>
    %81 = tpu.concatenate %79, %80 in 1 : vector<2x32xf32>, vector<2x32xf32> -> vector<2x64xf32>
    %82 = vector.extract_strided_slice %59 {offsets = [0, 0], sizes = [2, 32], strides = [1, 1]} : vector<2x64xf32> to vector<2x32xf32>
    %83 = vector.extract_strided_slice %39 {offsets = [0, 32], sizes = [2, 32], strides = [1, 1]} : vector<2x64xf32> to vector<2x32xf32>
    %84 = tpu.concatenate %82, %83 in 1 : vector<2x32xf32>, vector<2x32xf32> -> vector<2x64xf32>
    %85 = vector.extract_strided_slice %63 {offsets = [0, 0], sizes = [2, 32], strides = [1, 1]} : vector<2x64xf32> to vector<2x32xf32>
    %86 = vector.extract_strided_slice %35 {offsets = [0, 32], sizes = [2, 32], strides = [1, 1]} : vector<2x64xf32> to vector<2x32xf32>
    %87 = tpu.concatenate %85, %86 in 1 : vector<2x32xf32>, vector<2x32xf32> -> vector<2x64xf32>
    %88 = tpu.concatenate %66, %69, %72, %75, %78, %81, %84, %87 in 0 : vector<2x64xf32>, vector<2x64xf32>, vector<2x64xf32>, vector<2x64xf32>, vector<2x64xf32>, vector<2x64xf32>, vector<2x64xf32>, vector<2x64xf32> -> vector<16x64xf32>
    %c0_24 = arith.constant 0 : index
    %c0_25 = arith.constant 0 : index
    %89 = vector.load %arg4[%c0_24, %c0_25] : memref<64x64xf32, #tpu.memory_space<vmem>>, vector<64x64xf32>
    %c0_26 = arith.constant 0 : index
    %c0_27 = arith.constant 0 : index
    %90 = vector.load %arg5[%c0_26, %c0_27] : memref<64x64xf32, #tpu.memory_space<vmem>>, vector<64x64xf32>
    %c0_28 = arith.constant 0 : index
    %c0_29 = arith.constant 0 : index
    %91 = vector.load %arg6[%c0_28, %c0_29] : memref<1x64xf32, #tpu.memory_space<vmem>>, vector<1x64xf32>
    %cst_30 = arith.constant dense<0.000000e+00> : vector<16x64xf32>
    %92 = tpu.matmul %88, %89, %cst_30 {dimension_numbers = #tpu.dot_dimension_numbers<[1], [0], [0], [1], [0, 0, 1, 1], [], []>} : vector<16x64xf32>, vector<64x64xf32>, vector<16x64xf32> -> vector<16x64xf32>
    %93 = vector.broadcast %91 : vector<1x64xf32> to vector<16x64xf32>
    %94 = arith.addf %92, %93 : vector<16x64xf32>
    %95 = vector.extract_strided_slice %94 {offsets = [0, 0], sizes = [2, 32], strides = [1, 1]} : vector<16x64xf32> to vector<2x32xf32>
    %96 = vector.extract_strided_slice %94 {offsets = [14, 32], sizes = [2, 32], strides = [1, 1]} : vector<16x64xf32> to vector<2x32xf32>
    %97 = tpu.concatenate %95, %96 in 1 : vector<2x32xf32>, vector<2x32xf32> -> vector<2x64xf32>
    %98 = vector.extract_strided_slice %94 {offsets = [2, 0], sizes = [2, 32], strides = [1, 1]} : vector<16x64xf32> to vector<2x32xf32>
    %99 = vector.extract_strided_slice %94 {offsets = [12, 32], sizes = [2, 32], strides = [1, 1]} : vector<16x64xf32> to vector<2x32xf32>
    %100 = tpu.concatenate %98, %99 in 1 : vector<2x32xf32>, vector<2x32xf32> -> vector<2x64xf32>
    %101 = vector.extract_strided_slice %94 {offsets = [4, 0], sizes = [2, 32], strides = [1, 1]} : vector<16x64xf32> to vector<2x32xf32>
    %102 = vector.extract_strided_slice %94 {offsets = [10, 32], sizes = [2, 32], strides = [1, 1]} : vector<16x64xf32> to vector<2x32xf32>
    %103 = tpu.concatenate %101, %102 in 1 : vector<2x32xf32>, vector<2x32xf32> -> vector<2x64xf32>
    %104 = vector.extract_strided_slice %94 {offsets = [6, 0], sizes = [2, 32], strides = [1, 1]} : vector<16x64xf32> to vector<2x32xf32>
    %105 = vector.extract_strided_slice %94 {offsets = [8, 32], sizes = [2, 32], strides = [1, 1]} : vector<16x64xf32> to vector<2x32xf32>
    %106 = tpu.concatenate %104, %105 in 1 : vector<2x32xf32>, vector<2x32xf32> -> vector<2x64xf32>
    %107 = vector.extract_strided_slice %94 {offsets = [8, 0], sizes = [2, 32], strides = [1, 1]} : vector<16x64xf32> to vector<2x32xf32>
    %108 = vector.extract_strided_slice %94 {offsets = [6, 32], sizes = [2, 32], strides = [1, 1]} : vector<16x64xf32> to vector<2x32xf32>
    %109 = tpu.concatenate %107, %108 in 1 : vector<2x32xf32>, vector<2x32xf32> -> vector<2x64xf32>
    %110 = vector.extract_strided_slice %94 {offsets = [10, 0], sizes = [2, 32], strides = [1, 1]} : vector<16x64xf32> to vector<2x32xf32>
    %111 = vector.extract_strided_slice %94 {offsets = [4, 32], sizes = [2, 32], strides = [1, 1]} : vector<16x64xf32> to vector<2x32xf32>
    %112 = tpu.concatenate %110, %111 in 1 : vector<2x32xf32>, vector<2x32xf32> -> vector<2x64xf32>
    %113 = vector.extract_strided_slice %94 {offsets = [12, 0], sizes = [2, 32], strides = [1, 1]} : vector<16x64xf32> to vector<2x32xf32>
    %114 = vector.extract_strided_slice %94 {offsets = [2, 32], sizes = [2, 32], strides = [1, 1]} : vector<16x64xf32> to vector<2x32xf32>
    %115 = tpu.concatenate %113, %114 in 1 : vector<2x32xf32>, vector<2x32xf32> -> vector<2x64xf32>
    %116 = vector.extract_strided_slice %94 {offsets = [14, 0], sizes = [2, 32], strides = [1, 1]} : vector<16x64xf32> to vector<2x32xf32>
    %117 = vector.extract_strided_slice %94 {offsets = [0, 32], sizes = [2, 32], strides = [1, 1]} : vector<16x64xf32> to vector<2x32xf32>
    %118 = tpu.concatenate %116, %117 in 1 : vector<2x32xf32>, vector<2x32xf32> -> vector<2x64xf32>
    %cst_31 = arith.constant 0.000000e+00 : f32
    %119 = vector.broadcast %cst_31 : f32 to vector<2x64xf32>
    %cst_32 = arith.constant dense<0.000000e+00> : vector<2x64xf32>
    %120 = tpu.matmul %119, %90, %cst_32 {dimension_numbers = #tpu.dot_dimension_numbers<[1], [0], [0], [1], [0, 0, 1, 1], [], []>} : vector<2x64xf32>, vector<64x64xf32>, vector<2x64xf32> -> vector<2x64xf32>
    %121 = arith.addf %97, %120 : vector<2x64xf32>
    %cst_33 = arith.constant 0.000000e+00 : f32
    %122 = vector.broadcast %cst_33 : f32 to vector<2x64xf32>
    %123 = arith.maximumf %121, %122 : vector<2x64xf32>
    %cst_34 = arith.constant dense<0.000000e+00> : vector<2x64xf32>
    %124 = tpu.matmul %123, %90, %cst_34 {dimension_numbers = #tpu.dot_dimension_numbers<[1], [0], [0], [1], [0, 0, 1, 1], [], []>} : vector<2x64xf32>, vector<64x64xf32>, vector<2x64xf32> -> vector<2x64xf32>
    %125 = arith.addf %100, %124 : vector<2x64xf32>
    %cst_35 = arith.constant 0.000000e+00 : f32
    %126 = vector.broadcast %cst_35 : f32 to vector<2x64xf32>
    %127 = arith.maximumf %125, %126 : vector<2x64xf32>
    %cst_36 = arith.constant dense<0.000000e+00> : vector<2x64xf32>
    %128 = tpu.matmul %127, %90, %cst_36 {dimension_numbers = #tpu.dot_dimension_numbers<[1], [0], [0], [1], [0, 0, 1, 1], [], []>} : vector<2x64xf32>, vector<64x64xf32>, vector<2x64xf32> -> vector<2x64xf32>
    %129 = arith.addf %103, %128 : vector<2x64xf32>
    %cst_37 = arith.constant 0.000000e+00 : f32
    %130 = vector.broadcast %cst_37 : f32 to vector<2x64xf32>
    %131 = arith.maximumf %129, %130 : vector<2x64xf32>
    %cst_38 = arith.constant dense<0.000000e+00> : vector<2x64xf32>
    %132 = tpu.matmul %131, %90, %cst_38 {dimension_numbers = #tpu.dot_dimension_numbers<[1], [0], [0], [1], [0, 0, 1, 1], [], []>} : vector<2x64xf32>, vector<64x64xf32>, vector<2x64xf32> -> vector<2x64xf32>
    %133 = arith.addf %106, %132 : vector<2x64xf32>
    %cst_39 = arith.constant 0.000000e+00 : f32
    %134 = vector.broadcast %cst_39 : f32 to vector<2x64xf32>
    %135 = arith.maximumf %133, %134 : vector<2x64xf32>
    %cst_40 = arith.constant dense<0.000000e+00> : vector<2x64xf32>
    %136 = tpu.matmul %135, %90, %cst_40 {dimension_numbers = #tpu.dot_dimension_numbers<[1], [0], [0], [1], [0, 0, 1, 1], [], []>} : vector<2x64xf32>, vector<64x64xf32>, vector<2x64xf32> -> vector<2x64xf32>
    %137 = arith.addf %109, %136 : vector<2x64xf32>
    %cst_41 = arith.constant 0.000000e+00 : f32
    %138 = vector.broadcast %cst_41 : f32 to vector<2x64xf32>
    %139 = arith.maximumf %137, %138 : vector<2x64xf32>
    %cst_42 = arith.constant dense<0.000000e+00> : vector<2x64xf32>
    %140 = tpu.matmul %139, %90, %cst_42 {dimension_numbers = #tpu.dot_dimension_numbers<[1], [0], [0], [1], [0, 0, 1, 1], [], []>} : vector<2x64xf32>, vector<64x64xf32>, vector<2x64xf32> -> vector<2x64xf32>
    %141 = arith.addf %112, %140 : vector<2x64xf32>
    %cst_43 = arith.constant 0.000000e+00 : f32
    %142 = vector.broadcast %cst_43 : f32 to vector<2x64xf32>
    %143 = arith.maximumf %141, %142 : vector<2x64xf32>
    %cst_44 = arith.constant dense<0.000000e+00> : vector<2x64xf32>
    %144 = tpu.matmul %143, %90, %cst_44 {dimension_numbers = #tpu.dot_dimension_numbers<[1], [0], [0], [1], [0, 0, 1, 1], [], []>} : vector<2x64xf32>, vector<64x64xf32>, vector<2x64xf32> -> vector<2x64xf32>
    %145 = arith.addf %115, %144 : vector<2x64xf32>
    %cst_45 = arith.constant 0.000000e+00 : f32
    %146 = vector.broadcast %cst_45 : f32 to vector<2x64xf32>
    %147 = arith.maximumf %145, %146 : vector<2x64xf32>
    %cst_46 = arith.constant dense<0.000000e+00> : vector<2x64xf32>
    %148 = tpu.matmul %147, %90, %cst_46 {dimension_numbers = #tpu.dot_dimension_numbers<[1], [0], [0], [1], [0, 0, 1, 1], [], []>} : vector<2x64xf32>, vector<64x64xf32>, vector<2x64xf32> -> vector<2x64xf32>
    %149 = arith.addf %118, %148 : vector<2x64xf32>
    %cst_47 = arith.constant 0.000000e+00 : f32
    %150 = vector.broadcast %cst_47 : f32 to vector<2x64xf32>
    %151 = arith.maximumf %149, %150 : vector<2x64xf32>
    %152 = vector.extract_strided_slice %123 {offsets = [0, 0], sizes = [2, 32], strides = [1, 1]} : vector<2x64xf32> to vector<2x32xf32>
    %153 = vector.extract_strided_slice %151 {offsets = [0, 32], sizes = [2, 32], strides = [1, 1]} : vector<2x64xf32> to vector<2x32xf32>
    %154 = tpu.concatenate %152, %153 in 1 : vector<2x32xf32>, vector<2x32xf32> -> vector<2x64xf32>
    %155 = vector.extract_strided_slice %127 {offsets = [0, 0], sizes = [2, 32], strides = [1, 1]} : vector<2x64xf32> to vector<2x32xf32>
    %156 = vector.extract_strided_slice %147 {offsets = [0, 32], sizes = [2, 32], strides = [1, 1]} : vector<2x64xf32> to vector<2x32xf32>
    %157 = tpu.concatenate %155, %156 in 1 : vector<2x32xf32>, vector<2x32xf32> -> vector<2x64xf32>
    %158 = vector.extract_strided_slice %131 {offsets = [0, 0], sizes = [2, 32], strides = [1, 1]} : vector<2x64xf32> to vector<2x32xf32>
    %159 = vector.extract_strided_slice %143 {offsets = [0, 32], sizes = [2, 32], strides = [1, 1]} : vector<2x64xf32> to vector<2x32xf32>
    %160 = tpu.concatenate %158, %159 in 1 : vector<2x32xf32>, vector<2x32xf32> -> vector<2x64xf32>
    %161 = vector.extract_strided_slice %135 {offsets = [0, 0], sizes = [2, 32], strides = [1, 1]} : vector<2x64xf32> to vector<2x32xf32>
    %162 = vector.extract_strided_slice %139 {offsets = [0, 32], sizes = [2, 32], strides = [1, 1]} : vector<2x64xf32> to vector<2x32xf32>
    %163 = tpu.concatenate %161, %162 in 1 : vector<2x32xf32>, vector<2x32xf32> -> vector<2x64xf32>
    %164 = vector.extract_strided_slice %139 {offsets = [0, 0], sizes = [2, 32], strides = [1, 1]} : vector<2x64xf32> to vector<2x32xf32>
    %165 = vector.extract_strided_slice %135 {offsets = [0, 32], sizes = [2, 32], strides = [1, 1]} : vector<2x64xf32> to vector<2x32xf32>
    %166 = tpu.concatenate %164, %165 in 1 : vector<2x32xf32>, vector<2x32xf32> -> vector<2x64xf32>
    %167 = vector.extract_strided_slice %143 {offsets = [0, 0], sizes = [2, 32], strides = [1, 1]} : vector<2x64xf32> to vector<2x32xf32>
    %168 = vector.extract_strided_slice %131 {offsets = [0, 32], sizes = [2, 32], strides = [1, 1]} : vector<2x64xf32> to vector<2x32xf32>
    %169 = tpu.concatenate %167, %168 in 1 : vector<2x32xf32>, vector<2x32xf32> -> vector<2x64xf32>
    %170 = vector.extract_strided_slice %147 {offsets = [0, 0], sizes = [2, 32], strides = [1, 1]} : vector<2x64xf32> to vector<2x32xf32>
    %171 = vector.extract_strided_slice %127 {offsets = [0, 32], sizes = [2, 32], strides = [1, 1]} : vector<2x64xf32> to vector<2x32xf32>
    %172 = tpu.concatenate %170, %171 in 1 : vector<2x32xf32>, vector<2x32xf32> -> vector<2x64xf32>
    %173 = vector.extract_strided_slice %151 {offsets = [0, 0], sizes = [2, 32], strides = [1, 1]} : vector<2x64xf32> to vector<2x32xf32>
    %174 = vector.extract_strided_slice %123 {offsets = [0, 32], sizes = [2, 32], strides = [1, 1]} : vector<2x64xf32> to vector<2x32xf32>
    %175 = tpu.concatenate %173, %174 in 1 : vector<2x32xf32>, vector<2x32xf32> -> vector<2x64xf32>
    %176 = tpu.concatenate %154, %157, %160, %163, %166, %169, %172, %175 in 0 : vector<2x64xf32>, vector<2x64xf32>, vector<2x64xf32>, vector<2x64xf32>, vector<2x64xf32>, vector<2x64xf32>, vector<2x64xf32>, vector<2x64xf32> -> vector<16x64xf32>
    %c0_48 = arith.constant 0 : index
    %c0_49 = arith.constant 0 : index
    %177 = vector.load %arg7[%c0_48, %c0_49] : memref<1x64xf32, #tpu.memory_space<vmem>>, vector<1x64xf32>
    %178 = vector.broadcast %177 : vector<1x64xf32> to vector<16x64xf32>
    %179 = arith.mulf %176, %178 : vector<16x64xf32>
    %cst_50 = arith.constant dense<0.000000e+00> : vector<16xf32>
    %180 = vector.multi_reduction <add>, %179, %cst_50 [1] : vector<16x64xf32> to vector<16xf32>
    %181 = vector.shape_cast %180 : vector<16xf32> to vector<16x1xf32>
    %c0_51 = arith.constant 0 : index
    %c0_52 = arith.constant 0 : index
    %182 = vector.load %arg8[%c0_51, %c0_52] : memref<1x1xf32, #tpu.memory_space<vmem>>, vector<1x1xf32>
    %183 = vector.broadcast %182 : vector<1x1xf32> to vector<16x1xf32>
    %184 = arith.addf %181, %183 : vector<16x1xf32>
    %cst_53 = arith.constant 0.000000e+00 : f32
    %185 = vector.broadcast %cst_53 : f32 to vector<16x1xf32>
    %186 = arith.subf %185, %184 : vector<16x1xf32>
    %187 = math.exp %186 : vector<16x1xf32>
    %cst_54 = arith.constant 1.000000e+00 : f32
    %188 = vector.broadcast %cst_54 : f32 to vector<16x1xf32>
    %189 = arith.addf %188, %187 : vector<16x1xf32>
    %cst_55 = arith.constant 1.000000e+00 : f32
    %190 = vector.broadcast %cst_55 : f32 to vector<16x1xf32>
    %191 = arith.divf %190, %189 : vector<16x1xf32>
    %192 = arith.cmpf one, %191, %191 : vector<16x1xf32>
    %cst_56 = arith.constant 0.000000e+00 : f32
    %193 = vector.broadcast %cst_56 : f32 to vector<16x1xf32>
    %194 = arith.select %192, %193, %191 : vector<16x1xi1>, vector<16x1xf32>
    %c0_57 = arith.constant 0 : index
    %c0_58 = arith.constant 0 : index
    %195 = vector.load %arg9[%c0_57, %c0_58] : memref<16x1xf32, #tpu.memory_space<vmem>>, vector<16x1xf32>
    tpu.vector_store %arg9[%c0_57, %c0_58], %194 {strides = array<i32>} : memref<16x1xf32, #tpu.memory_space<vmem>>, vector<16x1xf32>,
    return
  }
}

</mosaic_0001>

<bundles_post_ra>
// kernel: recreated_model_forward.1
= control target key start
LH: loop header
LB: loop body
LE: loop exit
PB: predicated region body
PF: predicated region fallthrough
CT: control target
= control target key end

     0   :  { %vm59_vm0 = vcmask 1043456   ;;  %v2142_v0 = vmov 0.0   ;;  %vm52_vm1 = vcmask 31744   ;;  %vm2143_vm2 = vmmov 0   ;;  %s2757_s2 = inlined_call_operand.vmem [shape: f32[64,64], index: 2, kind: input, shape index: {}]   ;;  %s2758_s1 = inlined_call_operand.vmem [shape: f32[4,64], index: 1, kind: input, shape index: {}]   ;;  %s2759_s0 = inlined_call_operand.vmem [shape: f32[16,4], index: 0, kind: input, shape index: {}]   ;;  %s2760_s3 = inlined_call_operand.vmem [shape: f32[1,64], index: 3, kind: input, shape index: {}]   ;;  %s2761_s4 = inlined_call_operand.vmem [shape: f32[64,64], index: 4, kind: input, shape index: {}]   ;;  %s2762_s5 = inlined_call_operand.vmem [shape: f32[64,64], index: 5, kind: input, shape index: {}]   ;;  %s2763_s6 = inlined_call_operand.vmem [shape: f32[1,64], index: 6, kind: input, shape index: {}]   ;;  %s2764_s8 = inlined_call_operand.<no memory space> [shape: f32[1,1], index: 8, kind: input, shape index: {}]   ;;  %s2765_s7 = inlined_call_operand.vmem [shape: f32[1,64], index: 7, kind: input, shape index: {}]   ;;  %s2766_s9 = inlined_call_operand.vmem [shape: f32[16,1], index: 9, kind: output, shape index: {}]  }
   0x1   :  { %1809 = vmatprep.subr.mxu1 %v2142_v0  ;;  %v2198_v1 = vld [vmem:[%s2757_s2 + $0x38] sm:$0xff]  ;;  %v2203_v2 = vld [vmem:[%s2757_s2 + $0x30] sm:$0xff]  ;;  %v36_v3 = vld [vmem:[%s2758_s1] sm:$0xf]  ;;  %1825 = vmatprep.mubr.msk.f32.mxu1 %vm2143_vm2, %v2142_v0  ;;  %vm141_vm3 = vcmask 261120   ;;  %vm153_vm4 = vcmask 523264  }
   0x2   :  { %1810 = vmatpush3.msra.mxu1 %v2198_v1  ;;  %1804 = vmatprep.subr.msk.mxu0 %vm59_vm0, %v36_v3  ;;  %v34_v4 = vld [vmem:[%s2759_s0] sm:$0xff]  ;;  %v35_v5 = vld [vmem:[%s2759_s0 + $0x8] sm:$0xff]  ;;  %v2238_v8 = vld [vmem:[%s2757_s2 + $0x18] sm:$0xff]  ;;  %vm801_vm5 = vcmask 1041408   ;;  %vm804_vm6 = vcmask 1045504   ;;  %vm1617_vm7 = vcmask 7168  }
   0x3   :  { %1811 = vmatprep.subr.mxu1 %v2142_v0  ;;  %v2222_v6 = vld [vmem:[%s2757_s2 + $0x28] sm:$0xff]  ;;  %1805 = vmatpush3.msk.msra.mxu0 %vm59_vm0, %v36_v3  ;;  %v2230_v7 = vld [vmem:[%s2757_s2 + $0x20] sm:$0xff]  ;;  %v2247_v9 = vld [vmem:[%s2757_s2 + $0x10] sm:$0xff] }
   0x4   :  { %1812 = vmatpush3.msra.mxu1 %v2203_v2  ;;  %1806 = vmatprep.mubr.msk.f32.mxu0 %vm52_vm1, %v34_v4  ;;  %v2256_v10 = vld [vmem:[%s2757_s2 + $0x8] sm:$0xff]  ;;  %v2265_v11 = vld [vmem:[%s2757_s2] sm:$0xff]  ;;  %v816_v61 = vld [vmem:[%s2761_s4 + $0x38] sm:$0xff] }
   0x5   :  { %1813 = vmatprep.subr.mxu1 %v2142_v0  ;;  %1807 = vmatmul.mubr.msk.f32.vlgmr.msra.gmra.mxu0 %vm52_vm1, %v35_v5  ;;  %v1624_v12 = vld [vmem:[%s2760_s3] ss:$0 sm:$0xff] }
   0x6   :  { %1814 = vmatpush3.msra.mxu1 %v2222_v6  ;;  %1828 = vmatprep.subr.mxu0 %v2142_v0 }
   0x7   :  { %1815 = vmatprep.subr.mxu1 %v2142_v0  ;;  %1829 = vmatpush3.msra.mxu0 %v2198_v1 }
   0x8   :  { %1816 = vmatpush3.msra.mxu1 %v2230_v7  ;;  %1830 = vmatprep.subr.mxu0 %v2142_v0 }
   0x9   :  { %1817 = vmatprep.subr.mxu1 %v2142_v0  ;;  %1831 = vmatpush3.msra.mxu0 %v2203_v2 }
   0xa   :  { %1818 = vmatpush3.msra.mxu1 %v2238_v8  ;;  %1832 = vmatprep.subr.mxu0 %v2142_v0 }
   0xb   :  { %1819 = vmatprep.subr.mxu1 %v2142_v0  ;;  %1833 = vmatpush3.msra.mxu0 %v2222_v6 }
   0xc   :  { %1820 = vmatpush3.msra.mxu1 %v2247_v9  ;;  %1834 = vmatprep.subr.mxu0 %v2142_v0 }
   0xd   :  { %1821 = vmatprep.subr.mxu1 %v2142_v0  ;;  %1835 = vmatpush3.msra.mxu0 %v2230_v7 }
   0xe   :  { %1822 = vmatpush3.msra.mxu1 %v2256_v10  ;;  %1836 = vmatprep.subr.mxu0 %v2142_v0 }
   0xf   :  { %1823 = vmatprep.subr.mxu1 %v2142_v0  ;;  %1837 = vmatpush3.msra.mxu0 %v2238_v8 }
  0x10   :  { %1824 = vmatpush3.msra.mxu1 %v2265_v11  ;;  %1838 = vmatprep.subr.mxu0 %v2142_v0 }
  0x11   :  { %1826 = vmatmul.mubr.f32.vlgmr.msra.gmra.mxu1 %v2142_v0  ;;  %1839 = vmatpush3.msra.mxu0 %v2247_v9 }
  0x12   :  { %1840 = vmatprep.subr.mxu0 %v2142_v0  ;;  %1844 = vmatprep.mubr.msk.f32.mxu0 %vm2143_vm2, %v2142_v0 }
  0x13   :  { %1841 = vmatpush3.msra.mxu0 %v2256_v10  ;;  %1847 = vmatprep.subr.mxu1 %v2142_v0 }
  0x14   :  { %1842 = vmatprep.subr.mxu0 %v2142_v0  ;;  %1848 = vmatpush3.msra.mxu1 %v2198_v1 }
  0x15   :  { %1843 = vmatpush3.msra.mxu0 %v2265_v11  ;;  %1849 = vmatprep.subr.mxu1 %v2142_v0 }
  0x16   :  { %1850 = vmatpush3.msra.mxu1 %v2203_v2  ;;  %1863 = vmatprep.mubr.msk.f32.mxu1 %vm2143_vm2, %v2142_v0 }
  0x17   :  { %1851 = vmatprep.subr.mxu1 %v2142_v0  ;;  %1866 = vmatprep.subr.mxu0 %v2142_v0 }
  0x18   :  { %1852 = vmatpush3.msra.mxu1 %v2222_v6 }
  0x19   :  { %1853 = vmatprep.subr.mxu1 %v2142_v0 }
  0x1a   :  { %1854 = vmatpush3.msra.mxu1 %v2230_v7 }
  0x1b   :  { %1855 = vmatprep.subr.mxu1 %v2142_v0 }
  0x1c   :  { %1856 = vmatpush3.msra.mxu1 %v2238_v8 }
  0x1d   :  { %1857 = vmatprep.subr.mxu1 %v2142_v0 }
  0x1e   :  { %1858 = vmatpush3.msra.mxu1 %v2247_v9 }
  0x1f   :  { %1859 = vmatprep.subr.mxu1 %v2142_v0 }
  0x20   :  { %1860 = vmatpush3.msra.mxu1 %v2256_v10 }
  0x21   :  { %1861 = vmatprep.subr.mxu1 %v2142_v0 }
  0x22   :  { %1862 = vmatpush3.msra.mxu1 %v2265_v11 }
  0x23   :  { %1885 = vmatprep.subr.mxu1 %v2142_v0 }
  0xc5   :  { %v1808_v13 = vpop.f32.mrf.mxu0 }
  0xc6   :  { %v135_v14 = vadd.f32 %v1808_v13, %v1624_v12  ;;  %v812_v13 = vld [vmem:[%s2761_s4 + $0x18] sm:$0xff] }
  0xc7   :  { %v129_v15 = vpop.f32.mrf.mxu0 }
  0xc8   :  { %v130_v16 = vadd.f32 %v1624_v12, %v129_v15  ;;  %v143_v17 = vrot.slane %v135_v14, 2  ;;  %v139_v23 = vrot.slane %v135_v14, 6  ;;  %v2475_v12 = vld [vmem:[%s2762_s5 + $0x30] sm:$0xff] }
  0xc9   :  { %v811_v15 = vld [vmem:[%s2761_s4 + $0x10] sm:$0xff] }
  0xca   :  { %v2306_v18 = vsel %vm141_vm3, %v130_v16, %v143_v17  ;;  %v147_v19 = vrot.slane %v130_v16, 6  ;;  %v150_v20 = vrot.slane %v130_v16, 2  ;;  %v142_v24 = vsel %vm141_vm3, %v130_v16, %v139_v23  ;;  %v2495_v16 = vld [vmem:[%s2762_s5 + $0x20] sm:$0xff]  ;;  %v810_v17 = vld [vmem:[%s2761_s4 + $0x8] sm:$0xff] }
  0xcb   :  { %v2528_v23 = vld [vmem:[%s2762_s5] sm:$0xff] }
  0xcc   :  { %v2309_v21 = vsel %vm141_vm3, %v135_v14, %v147_v19  ;;  %v2312_v22 = vsel %vm141_vm3, %v135_v14, %v150_v20  ;;  %v2485_v14 = vld [vmem:[%s2762_s5 + $0x28] sm:$0xff]  ;;  %v809_v19 = vld [vmem:[%s2761_s4] sm:$0xff]  ;;  %v2514_v20 = vld [vmem:[%s2762_s5 + $0x10] sm:$0xff] }
  0xd1   :  { %v223_v25 = vpop.f32.mrf.mxu1 }
  0xd2   :  { %v227_v26 = vadd.f32 %v223_v25, %v142_v24 }
  0xd3   :  { %v1827_v27 = vpop.f32.mrf.mxu1 }
  0xd4   :  { %v2315_v28 = vmax.f32 %v227_v26, 0.0 }
  0xd6   :  { %1845 = vmatmul.mubr.msk.f32.vlgmr.msra.gmra.mxu0 %vm153_vm4, %v2315_v28 }
  0xd7   :  { %1867 = vmatpush3.msra.mxu0 %v2198_v1  ;;  %1882 = vmatprep.mubr.msk.f32.mxu0 %vm2143_vm2, %v2142_v0 }
  0xd8   :  { %1868 = vmatprep.subr.mxu0 %v2142_v0 }
  0xd9   :  { %1869 = vmatpush3.msra.mxu0 %v2203_v2 }
  0xda   :  { %1870 = vmatprep.subr.mxu0 %v2142_v0 }
  0xdb   :  { %1871 = vmatpush3.msra.mxu0 %v2222_v6 }
  0xdc   :  { %1872 = vmatprep.subr.mxu0 %v2142_v0 }
  0xdd   :  { %1873 = vmatpush3.msra.mxu0 %v2230_v7 }
  0xde   :  { %1874 = vmatprep.subr.mxu0 %v2142_v0 }
  0xdf   :  { %1875 = vmatpush3.msra.mxu0 %v2238_v8 }
  0xe0   :  { %1876 = vmatprep.subr.mxu0 %v2142_v0 }
  0xe1   :  { %1877 = vmatpush3.msra.mxu0 %v2247_v9 }
  0xe2   :  { %1878 = vmatprep.subr.mxu0 %v2142_v0 }
  0xe3   :  { %1879 = vmatpush3.msra.mxu0 %v2256_v10 }
  0xe4   :  { %1880 = vmatprep.subr.mxu0 %v2142_v0 }
  0xe5   :  { %1881 = vmatpush3.msra.mxu0 %v2265_v11 }
  0xe6   :  { %1904 = vmatprep.subr.mxu0 %v2142_v0 }
 0x196   :  { %v298_v29 = vpop.f32.mrf.mxu0 }
 0x197   :  { %v303_v30 = vrot.slane %v298_v29, 6 }
 0x198   :  { %v1846_v31 = vpop.f32.mrf.mxu0 }
 0x199   :  { %v305_v32 = vadd.f32 %v303_v30, %v2306_v18 }
 0x19b   :  { %v2338_v33 = vmax.f32 %v305_v32, 0.0 }
 0x19d   :  { %v308_v34 = vrot.slane %v2338_v33, 2  ;;  %v795_v3 = vrot.slane %v2338_v33, 6 }
 0x19f   :  { %1864 = vmatmul.mubr.msk.f32.vlgmr.msra.gmra.mxu1 %vm153_vm4, %v308_v34 }
 0x1a0   :  { %1886 = vmatpush3.msra.mxu1 %v2198_v1  ;;  %1901 = vmatprep.mubr.msk.f32.mxu1 %vm2143_vm2, %v2142_v0 }
 0x1a1   :  { %1887 = vmatprep.subr.mxu1 %v2142_v0 }
 0x1a2   :  { %1888 = vmatpush3.msra.mxu1 %v2203_v2 }
 0x1a3   :  { %1889 = vmatprep.subr.mxu1 %v2142_v0 }
 0x1a4   :  { %1890 = vmatpush3.msra.mxu1 %v2222_v6 }
 0x1a5   :  { %1891 = vmatprep.subr.mxu1 %v2142_v0 }
 0x1a6   :  { %1892 = vmatpush3.msra.mxu1 %v2230_v7 }
 0x1a7   :  { %1893 = vmatprep.subr.mxu1 %v2142_v0 }
 0x1a8   :  { %1894 = vmatpush3.msra.mxu1 %v2238_v8 }
 0x1a9   :  { %1895 = vmatprep.subr.mxu1 %v2142_v0 }
 0x1aa   :  { %1896 = vmatpush3.msra.mxu1 %v2247_v9 }
 0x1ab   :  { %1897 = vmatprep.subr.mxu1 %v2142_v0 }
 0x1ac   :  { %1898 = vmatpush3.msra.mxu1 %v2256_v10 }
 0x1ad   :  { %1899 = vmatprep.subr.mxu1 %v2142_v0 }
 0x1ae   :  { %1900 = vmatpush3.msra.mxu1 %v2265_v11 }
 0x1af   :  { %1923 = vmatprep.subr.mxu1 %v2142_v0 }
 0x25f   :  { %v377_v35 = vpop.f32.mrf.mxu1 }
 0x260   :  { %v382_v36 = vrot.slane %v377_v35, 4  ;;  %v798_v35 = vrot.slane %v2315_v28, 2 }
 0x261   :  { %v1865_v37 = vpop.f32.mrf.mxu1 }
 0x262   :  { %v384_v38 = vadd.f32 %v382_v36, %v142_v24 }
 0x264   :  { %v2360_v39 = vmax.f32 %v384_v38, 0.0 }
 0x266   :  { %v387_v40 = vrot.slane %v2360_v39, 4  ;;  %v792_v55 = vrot.slane %v2360_v39, 2 }
 0x268   :  { %1883 = vmatmul.mubr.msk.f32.vlgmr.msra.gmra.mxu0 %vm153_vm4, %v387_v40 }
 0x269   :  { %1905 = vmatpush3.msra.mxu0 %v2198_v1  ;;  %1920 = vmatprep.mubr.msk.f32.mxu0 %vm2143_vm2, %v2142_v0 }
 0x26a   :  { %1906 = vmatprep.subr.mxu0 %v2142_v0 }
 0x26b   :  { %1907 = vmatpush3.msra.mxu0 %v2203_v2 }
 0x26c   :  { %1908 = vmatprep.subr.mxu0 %v2142_v0 }
 0x26d   :  { %1909 = vmatpush3.msra.mxu0 %v2222_v6 }
 0x26e   :  { %1910 = vmatprep.subr.mxu0 %v2142_v0 }
 0x26f   :  { %1911 = vmatpush3.msra.mxu0 %v2230_v7 }
 0x270   :  { %1912 = vmatprep.subr.mxu0 %v2142_v0 }
 0x271   :  { %1913 = vmatpush3.msra.mxu0 %v2238_v8 }
 0x272   :  { %1914 = vmatprep.subr.mxu0 %v2142_v0 }
 0x273   :  { %1915 = vmatpush3.msra.mxu0 %v2247_v9 }
 0x274   :  { %1916 = vmatprep.subr.mxu0 %v2142_v0 }
 0x275   :  { %1917 = vmatpush3.msra.mxu0 %v2256_v10 }
 0x276   :  { %1918 = vmatprep.subr.mxu0 %v2142_v0 }
 0x277   :  { %1919 = vmatpush3.msra.mxu0 %v2265_v11 }
 0x278   :  { %1942 = vmatprep.subr.mxu0 %v2142_v0 }
 0x328   :  { %v456_v41 = vpop.f32.mrf.mxu0 }
 0x329   :  { %v461_v42 = vrot.slane %v456_v41, 2 }
 0x32a   :  { %v1884_v43 = vpop.f32.mrf.mxu0 }
 0x32b   :  { %v2383_v44 = vadd.f32 %v461_v42, %v2306_v18  ;;  %v2505_v18 = vld [vmem:[%s2762_s5 + $0x18] sm:$0xff] }
 0x32d   :  { %v464_v45 = vmax.f32 %v2383_v44, 0.0  ;;  %v1635_v44 = vld [vmem:[%s2763_s6] ss:$0 sm:$0xff] }
 0x32f   :  { %v466_v46 = vrot.slane %v464_v45, 6 }
 0x331   :  { %1902 = vmatmul.mubr.msk.f32.vlgmr.msra.gmra.mxu1 %vm153_vm4, %v466_v46 }
 0x332   :  { %1924 = vmatpush3.msra.mxu1 %v2198_v1  ;;  %1939 = vmatprep.mubr.msk.f32.mxu1 %vm2143_vm2, %v2142_v0 }
 0x333   :  { %1925 = vmatprep.subr.mxu1 %v2142_v0 }
 0x334   :  { %1926 = vmatpush3.msra.mxu1 %v2203_v2 }
 0x335   :  { %1927 = vmatprep.subr.mxu1 %v2142_v0 }
 0x336   :  { %1928 = vmatpush3.msra.mxu1 %v2222_v6 }
 0x337   :  { %1929 = vmatprep.subr.mxu1 %v2142_v0 }
 0x338   :  { %1930 = vmatpush3.msra.mxu1 %v2230_v7 }
 0x339   :  { %1931 = vmatprep.subr.mxu1 %v2142_v0 }
 0x33a   :  { %1932 = vmatpush3.msra.mxu1 %v2238_v8 }
 0x33b   :  { %1933 = vmatprep.subr.mxu1 %v2142_v0 }
 0x33c   :  { %1934 = vmatpush3.msra.mxu1 %v2247_v9 }
 0x33d   :  { %1935 = vmatprep.subr.mxu1 %v2142_v0 }
 0x33e   :  { %1936 = vmatpush3.msra.mxu1 %v2256_v10 }
 0x33f   :  { %1937 = vmatprep.subr.mxu1 %v2142_v0 }
 0x340   :  { %1938 = vmatpush3.msra.mxu1 %v2265_v11 }
 0x341   :  { %1961 = vmatprep.subr.mxu1 %v816_v61 }
 0x3f1   :  { %v535_v47 = vpop.f32.mrf.mxu1 }
 0x3f2   :  { %v539_v48 = vadd.f32 %v535_v47, %v2309_v21 }
 0x3f3   :  { %v1903_v49 = vpop.f32.mrf.mxu1 }
 0x3f4   :  { %v2407_v50 = vmax.f32 %v539_v48, 0.0 }
 0x3f6   :  { %1921 = vmatmul.mubr.msk.f32.vlgmr.msra.gmra.mxu0 %vm153_vm4, %v2407_v50  ;;  %v791_v57 = vsel %vm141_vm3, %v2407_v50, %v466_v46  ;;  %v787_v32 = vrot.slane %v2407_v50, 2 }
 0x3f7   :  { %1943 = vmatpush3.msra.mxu0 %v2198_v1  ;;  %1958 = vmatprep.mubr.msk.f32.mxu0 %vm2143_vm2, %v2142_v0 }
 0x3f8   :  { %1944 = vmatprep.subr.mxu0 %v2142_v0  ;;  %v789_v41 = vsel %vm141_vm3, %v464_v45, %v787_v32 }
 0x3f9   :  { %1945 = vmatpush3.msra.mxu0 %v2203_v2 }
 0x3fa   :  { %1946 = vmatprep.subr.mxu0 %v2142_v0 }
 0x3fb   :  { %1947 = vmatpush3.msra.mxu0 %v2222_v6 }
 0x3fc   :  { %1948 = vmatprep.subr.mxu0 %v2142_v0 }
 0x3fd   :  { %1949 = vmatpush3.msra.mxu0 %v2230_v7 }
 0x3fe   :  { %1950 = vmatprep.subr.mxu0 %v2142_v0 }
 0x3ff   :  { %1951 = vmatpush3.msra.mxu0 %v2238_v8  ;;  %v815_v8 = vld [vmem:[%s2761_s4 + $0x30] sm:$0xff] }
 0x400   :  { %1952 = vmatprep.subr.mxu0 %v2142_v0 }
 0x401   :  { %1953 = vmatpush3.msra.mxu0 %v2247_v9  ;;  %v814_v9 = vld [vmem:[%s2761_s4 + $0x28] sm:$0xff] }
 0x402   :  { %1954 = vmatprep.subr.mxu0 %v2142_v0 }
 0x403   :  { %1955 = vmatpush3.msra.mxu0 %v2256_v10  ;;  %v2465_v10 = vld [vmem:[%s2762_s5 + $0x38] sm:$0xff] }
 0x404   :  { %1956 = vmatprep.subr.mxu0 %v2142_v0 }
 0x405   :  { %1957 = vmatpush3.msra.mxu0 %v2265_v11  ;;  %v813_v11 = vld [vmem:[%s2761_s4 + $0x20] sm:$0xff] }
 0x406   :  { %1980 = vmatprep.subr.mxu0 %v2142_v0 }
 0x4b6   :  { %v610_v51 = vpop.f32.mrf.mxu0 }
 0x4b7   :  { %v615_v52 = vrot.slane %v610_v51, 6 }
 0x4b8   :  { %v1922_v53 = vpop.f32.mrf.mxu0 }
 0x4b9   :  { %v617_v54 = vadd.f32 %v615_v52, %v2312_v22 }
 0x4bb   :  { %v2431_v56 = vmax.f32 %v617_v54, 0.0 }
 0x4bd   :  { %v620_v58 = vrot.slane %v2431_v56, 2  ;;  %v794_v59 = vsel %vm141_vm3, %v2431_v56, %v792_v55  ;;  %v784_v31 = vrot.slane %v2431_v56, 6 }
 0x4be   :  { %v806_v60 = vsel %vm801_vm5, %v791_v57, %v794_v59 }
 0x4bf   :  { %1940 = vmatmul.mubr.msk.f32.vlgmr.msra.gmra.mxu1 %vm153_vm4, %v620_v58 }
 0x4c0   :  { %1962 = vmatpush3.msra.mxu1 %v816_v61 }
 0x4c1   :  { %1963 = vmatprep.subr.mxu1 %v815_v8 }
 0x4c2   :  { %1964 = vmatpush3.msra.mxu1 %v815_v8 }
 0x4c3   :  { %1965 = vmatprep.subr.mxu1 %v814_v9 }
 0x4c4   :  { %1966 = vmatpush3.msra.mxu1 %v814_v9 }
 0x4c5   :  { %1967 = vmatprep.subr.mxu1 %v813_v11 }
 0x4c6   :  { %1968 = vmatpush3.msra.mxu1 %v813_v11 }
 0x4c7   :  { %1969 = vmatprep.subr.mxu1 %v812_v13 }
 0x4c8   :  { %1970 = vmatpush3.msra.mxu1 %v812_v13 }
 0x4c9   :  { %1971 = vmatprep.subr.mxu1 %v811_v15 }
 0x4ca   :  { %1972 = vmatpush3.msra.mxu1 %v811_v15 }
 0x4cb   :  { %1973 = vmatprep.subr.mxu1 %v810_v17 }
 0x4cc   :  { %1974 = vmatpush3.msra.mxu1 %v810_v17 }
 0x4cd   :  { %1975 = vmatprep.subr.mxu1 %v809_v19 }
 0x4ce   :  { %1976 = vmatpush3.msra.mxu1 %v809_v19 }
 0x4cf   :  { %1999 = vmatprep.subr.mxu1 %v2142_v0 }
 0x57f   :  { %v689_v62 = vpop.f32.mrf.mxu1 }
 0x580   :  { %v694_v63 = vrot.slane %v689_v62, 4 }
 0x581   :  { %v1941_v1 = vpop.f32.mrf.mxu1 }
 0x582   :  { %v696_v2 = vadd.f32 %v694_v63, %v2309_v21  ;;  %v2522_v21 = vld [vmem:[%s2762_s5 + $0x8] sm:$0xff] }
 0x584   :  { %v2445_v4 = vmax.f32 %v696_v2, 0.0 }
 0x586   :  { %v699_v5 = vrot.slane %v2445_v4, 4  ;;  %v797_v6 = vsel %vm141_vm3, %v2445_v4, %v795_v3  ;;  %v781_v29 = vrot.slane %v2445_v4, 2 }
 0x587   :  { %v2451_v7 = vsel %vm59_vm0, %v806_v60, %v797_v6 }
 0x588   :  { %1959 = vmatmul.mubr.msk.f32.vlgmr.msra.gmra.mxu0 %vm153_vm4, %v699_v5  ;;  %v783_v37 = vsel %vm141_vm3, %v2338_v33, %v781_v29 }
 0x589   :  { %1996 = vmatprep.mubr.msk.f32.mxu0 %vm2143_vm2, %v2142_v0  ;;  %1981 = vmatpush3.msra.mxu0 %v2465_v10 }
 0x58a   :  { %1982 = vmatprep.subr.mxu0 %v2142_v0 }
 0x58b   :  { %1983 = vmatpush3.msra.mxu0 %v2475_v12 }
 0x58c   :  { %1984 = vmatprep.subr.mxu0 %v2142_v0 }
 0x58d   :  { %1985 = vmatpush3.msra.mxu0 %v2485_v14 }
 0x58e   :  { %1986 = vmatprep.subr.mxu0 %v2142_v0 }
 0x58f   :  { %1987 = vmatpush3.msra.mxu0 %v2495_v16 }
 0x590   :  { %1988 = vmatprep.subr.mxu0 %v2142_v0 }
 0x591   :  { %1989 = vmatpush3.msra.mxu0 %v2505_v18 }
 0x592   :  { %1990 = vmatprep.subr.mxu0 %v2142_v0 }
 0x593   :  { %1991 = vmatpush3.msra.mxu0 %v2514_v20 }
 0x594   :  { %1992 = vmatprep.subr.mxu0 %v2142_v0 }
 0x595   :  { %1993 = vmatpush3.msra.mxu0 %v2522_v21 }
 0x596   :  { %1994 = vmatprep.subr.mxu0 %v2142_v0 }
 0x597   :  { %1995 = vmatpush3.msra.mxu0 %v2528_v23 }
 0x598   :  { %1997 = vmatmul.mubr.f32.vlgmr.msra.gmra.mxu0 %v2142_v0  ;;  %2018 = vmatprep.subr.mxu0 %v2142_v0 }
 0x599   :  { %2019 = vmatpush3.msra.mxu0 %v2465_v10  ;;  %2034 = vmatprep.mubr.msk.f32.mxu0 %vm2143_vm2, %v2142_v0 }
 0x59a   :  { %2020 = vmatprep.subr.mxu0 %v2142_v0 }
 0x59b   :  { %2021 = vmatpush3.msra.mxu0 %v2475_v12 }
 0x59c   :  { %2022 = vmatprep.subr.mxu0 %v2142_v0 }
 0x59d   :  { %2023 = vmatpush3.msra.mxu0 %v2485_v14 }
 0x59e   :  { %2024 = vmatprep.subr.mxu0 %v2142_v0 }
 0x59f   :  { %2025 = vmatpush3.msra.mxu0 %v2495_v16 }
 0x5a0   :  { %2026 = vmatprep.subr.mxu0 %v2142_v0 }
 0x5a1   :  { %2027 = vmatpush3.msra.mxu0 %v2505_v18 }
 0x5a2   :  { %2028 = vmatprep.subr.mxu0 %v2142_v0 }
 0x5a3   :  { %2029 = vmatpush3.msra.mxu0 %v2514_v20 }
 0x5a4   :  { %2030 = vmatprep.subr.mxu0 %v2142_v0 }
 0x5a5   :  { %2031 = vmatpush3.msra.mxu0 %v2522_v21 }
 0x5a6   :  { %2032 = vmatprep.subr.mxu0 %v2142_v0 }
 0x5a7   :  { %2033 = vmatpush3.msra.mxu0 %v2528_v23 }
 0x5a8   :  { %2056 = vmatprep.subr.mxu0 %v2142_v0 }
 0x648   :  { %v768_v24 = vpop.f32.mrf.mxu0 }
 0x649   :  { %v773_v25 = vrot.slane %v768_v24, 2 }
 0x64a   :  { %v1960_v26 = vpop.f32.mrf.mxu0 }
 0x64b   :  { %v775_v27 = vadd.f32 %v773_v25, %v2312_v22  ;;  %v786_v22 = vsel %vm141_vm3, %v2360_v39, %v784_v31 }
 0x64d   :  { %v776_v30 = vmax.f32 %v775_v27, 0.0 }
 0x64f   :  { %v778_v34 = vrot.slane %v776_v30, 6  ;;  %v800_v38 = vsel %vm141_vm3, %v776_v30, %v798_v35 }
 0x651   :  { %v780_v36 = vsel %vm141_vm3, %v2315_v28, %v778_v34  ;;  %v808_v28 = vsel %vm804_vm6, %v2451_v7, %v800_v38 }
 0x652   :  { %v802_v40 = vsel %vm801_vm5, %v780_v36, %v783_v37 }
 0x653   :  { %v803_v42 = vsel %vm59_vm0, %v802_v40, %v786_v22  ;;  %v14_v22 = vstv %s2764_s8 }
 0x654   :  { %v805_v43 = vsel %vm804_vm6, %v803_v42, %v789_v41  ;;  %15 = vst [vmem:[#allocation2] sm:$0x1] %v14_v22 }
 0x655   :  { %1977 = vmatprep.mubr.msk.f32.mxu1 %vm153_vm4, %v805_v43 }
 0x656   :  { %1978 = vmatmul.mubr.msk.f32.vlgmr.msra.gmra.mxu1 %vm153_vm4, %v808_v28 }
 0x657   :  { %2000 = vmatpush3.msra.mxu1 %v2465_v10  ;;  %2015 = vmatprep.mubr.msk.f32.mxu1 %vm2143_vm2, %v2142_v0 }
 0x658   :  { %2001 = vmatprep.subr.mxu1 %v2142_v0  ;;  %v993_v33 = vpop.f32.mrf.mxu0 }
 0x659   :  { %2002 = vmatpush3.msra.mxu1 %v2475_v12 }
 0x65a   :  { %2003 = vmatprep.subr.mxu1 %v2142_v0  ;;  %v1998_v39 = vpop.f32.mrf.mxu0 }
 0x65b   :  { %2004 = vmatpush3.msra.mxu1 %v2485_v14 }
 0x65c   :  { %2005 = vmatprep.subr.mxu1 %v2142_v0 }
 0x65d   :  { %2006 = vmatpush3.msra.mxu1 %v2495_v16 }
 0x65e   :  { %2007 = vmatprep.subr.mxu1 %v2142_v0 }
 0x65f   :  { %2008 = vmatpush3.msra.mxu1 %v2505_v18 }
 0x660   :  { %2009 = vmatprep.subr.mxu1 %v2142_v0 }
 0x661   :  { %2010 = vmatpush3.msra.mxu1 %v2514_v20 }
 0x662   :  { %2011 = vmatprep.subr.mxu1 %v2142_v0 }
 0x663   :  { %2012 = vmatpush3.msra.mxu1 %v2522_v21 }
 0x664   :  { %2013 = vmatprep.subr.mxu1 %v2142_v0 }
 0x665   :  { %2014 = vmatpush3.msra.mxu1 %v2528_v23 }
 0x666   :  { %2037 = vmatprep.subr.mxu1 %v2142_v0 }
 0x716   :  { %v1979_v45 = vpop.f32.mrf.mxu1 }
 0x717   :  { %v910_v46 = vadd.f32 %v1979_v45, %v1635_v44 }
 0x718   :  { %v904_v47 = vpop.f32.mrf.mxu1 }
 0x719   :  { %v905_v48 = vadd.f32 %v1635_v44, %v904_v47  ;;  %v914_v49 = vrot.slane %v910_v46, 6  ;;  %v917_v50 = vrot.slane %v910_v46, 2 }
 0x71b   :  { %v916_v51 = vsel %vm141_vm3, %v905_v48, %v914_v49  ;;  %v2598_v52 = vsel %vm141_vm3, %v905_v48, %v917_v50  ;;  %v921_v53 = vrot.slane %v905_v48, 6  ;;  %v924_v54 = vrot.slane %v905_v48, 2 }
 0x71c   :  { %v997_v55 = vadd.f32 %v993_v33, %v916_v51 }
 0x71d   :  { %v2601_v56 = vsel %vm141_vm3, %v910_v46, %v921_v53  ;;  %v2604_v57 = vsel %vm141_vm3, %v910_v46, %v924_v54 }
 0x71e   :  { %v2606_v58 = vmax.f32 %v997_v55, 0.0  ;;  %v1645_v55 = vld [vmem:[%s2765_s7] ss:$0 sm:$0xff] }
 0x720   :  { %2016 = vmatmul.mubr.msk.f32.vlgmr.msra.gmra.mxu1 %vm153_vm4, %v2606_v58  ;;  %v1568_v44 = vrot.slane %v2606_v58, 2 }
 0x721   :  { %2038 = vmatpush3.msra.mxu1 %v2465_v10  ;;  %2053 = vmatprep.mubr.msk.f32.mxu1 %vm2143_vm2, %v2142_v0 }
 0x722   :  { %2039 = vmatprep.subr.mxu1 %v2142_v0 }
 0x723   :  { %2040 = vmatpush3.msra.mxu1 %v2475_v12 }
 0x724   :  { %2041 = vmatprep.subr.mxu1 %v2142_v0 }
 0x725   :  { %2042 = vmatpush3.msra.mxu1 %v2485_v14 }
 0x726   :  { %2043 = vmatprep.subr.mxu1 %v2142_v0 }
 0x727   :  { %2044 = vmatpush3.msra.mxu1 %v2495_v16 }
 0x728   :  { %2045 = vmatprep.subr.mxu1 %v2142_v0 }
 0x729   :  { %2046 = vmatpush3.msra.mxu1 %v2505_v18 }
 0x72a   :  { %2047 = vmatprep.subr.mxu1 %v2142_v0 }
 0x72b   :  { %2048 = vmatpush3.msra.mxu1 %v2514_v20 }
 0x72c   :  { %2049 = vmatprep.subr.mxu1 %v2142_v0 }
 0x72d   :  { %2050 = vmatpush3.msra.mxu1 %v2522_v21 }
 0x72e   :  { %2051 = vmatprep.subr.mxu1 %v2142_v0 }
 0x72f   :  { %2052 = vmatpush3.msra.mxu1 %v2528_v23 }
 0x730   :  { %2075 = vmatprep.subr.mxu1 %v2142_v0 }
 0x7e0   :  { %v1068_v59 = vpop.f32.mrf.mxu1 }
 0x7e1   :  { %v1073_v60 = vrot.slane %v1068_v59, 6 }
 0x7e2   :  { %v2017_v61 = vpop.f32.mrf.mxu1 }
 0x7e3   :  { %v1075_v62 = vadd.f32 %v1073_v60, %v2598_v52  ;;  %v1646_v61 = vld [vmem:[#allocation2] ss:$0 sm:$0xff] }
 0x7e5   :  { %v2629_v63 = vmax.f32 %v1075_v62, 0.0 }
 0x7e7   :  { %v1078_v1 = vrot.slane %v2629_v63, 2  ;;  %v1565_v34 = vrot.slane %v2629_v63, 6 }
 0x7e9   :  { %2035 = vmatmul.mubr.msk.f32.vlgmr.msra.gmra.mxu0 %vm153_vm4, %v1078_v1 }
 0x7ea   :  { %2057 = vmatpush3.msra.mxu0 %v2465_v10  ;;  %2072 = vmatprep.mubr.msk.f32.mxu0 %vm2143_vm2, %v2142_v0 }
 0x7eb   :  { %2058 = vmatprep.subr.mxu0 %v2142_v0 }
 0x7ec   :  { %2059 = vmatpush3.msra.mxu0 %v2475_v12 }
 0x7ed   :  { %2060 = vmatprep.subr.mxu0 %v2142_v0 }
 0x7ee   :  { %2061 = vmatpush3.msra.mxu0 %v2485_v14 }
 0x7ef   :  { %2062 = vmatprep.subr.mxu0 %v2142_v0 }
 0x7f0   :  { %2063 = vmatpush3.msra.mxu0 %v2495_v16 }
 0x7f1   :  { %2064 = vmatprep.subr.mxu0 %v2142_v0 }
 0x7f2   :  { %2065 = vmatpush3.msra.mxu0 %v2505_v18 }
 0x7f3   :  { %2066 = vmatprep.subr.mxu0 %v2142_v0 }
 0x7f4   :  { %2067 = vmatpush3.msra.mxu0 %v2514_v20 }
 0x7f5   :  { %2068 = vmatprep.subr.mxu0 %v2142_v0 }
 0x7f6   :  { %2069 = vmatpush3.msra.mxu0 %v2522_v21 }
 0x7f7   :  { %2070 = vmatprep.subr.mxu0 %v2142_v0 }
 0x7f8   :  { %2071 = vmatpush3.msra.mxu0 %v2528_v23 }
 0x7f9   :  { %2094 = vmatprep.subr.mxu0 %v2142_v0 }
 0x8a9   :  { %v1147_v2 = vpop.f32.mrf.mxu0 }
 0x8aa   :  { %v1152_v3 = vrot.slane %v1147_v2, 4 }
 0x8ab   :  { %v2036_v4 = vpop.f32.mrf.mxu0 }
 0x8ac   :  { %v1154_v5 = vadd.f32 %v1152_v3, %v916_v51 }
 0x8ae   :  { %v2651_v6 = vmax.f32 %v1154_v5, 0.0 }
 0x8b0   :  { %v1157_v7 = vrot.slane %v2651_v6, 4  ;;  %v1562_v27 = vrot.slane %v2651_v6, 2 }
 0x8b2   :  { %2054 = vmatmul.mubr.msk.f32.vlgmr.msra.gmra.mxu1 %vm153_vm4, %v1157_v7 }
 0x8b3   :  { %2076 = vmatpush3.msra.mxu1 %v2465_v10  ;;  %2091 = vmatprep.mubr.msk.f32.mxu1 %vm2143_vm2, %v2142_v0 }
 0x8b4   :  { %2077 = vmatprep.subr.mxu1 %v2142_v0 }
 0x8b5   :  { %2078 = vmatpush3.msra.mxu1 %v2475_v12 }
 0x8b6   :  { %2079 = vmatprep.subr.mxu1 %v2142_v0 }
 0x8b7   :  { %2080 = vmatpush3.msra.mxu1 %v2485_v14 }
 0x8b8   :  { %2081 = vmatprep.subr.mxu1 %v2142_v0 }
 0x8b9   :  { %2082 = vmatpush3.msra.mxu1 %v2495_v16 }
 0x8ba   :  { %2083 = vmatprep.subr.mxu1 %v2142_v0 }
 0x8bb   :  { %2084 = vmatpush3.msra.mxu1 %v2505_v18 }
 0x8bc   :  { %2085 = vmatprep.subr.mxu1 %v2142_v0 }
 0x8bd   :  { %2086 = vmatpush3.msra.mxu1 %v2514_v20 }
 0x8be   :  { %2087 = vmatprep.subr.mxu1 %v2142_v0 }
 0x8bf   :  { %2088 = vmatpush3.msra.mxu1 %v2522_v21 }
 0x8c0   :  { %2089 = vmatprep.subr.mxu1 %v2142_v0 }
 0x8c1   :  { %2090 = vmatpush3.msra.mxu1 %v2528_v23 }
 0x8c2   :  { %2113 = vmatprep.subr.mxu1 %v2142_v0 }
 0x972   :  { %v1226_v8 = vpop.f32.mrf.mxu1 }
 0x973   :  { %v1231_v9 = vrot.slane %v1226_v8, 2 }
 0x974   :  { %v2055_v11 = vpop.f32.mrf.mxu1 }
 0x975   :  { %v2674_v13 = vadd.f32 %v1231_v9, %v2598_v52 }
 0x977   :  { %v1234_v15 = vmax.f32 %v2674_v13, 0.0 }
 0x979   :  { %v1236_v17 = vrot.slane %v1234_v15, 6 }
 0x97b   :  { %2073 = vmatmul.mubr.msk.f32.vlgmr.msra.gmra.mxu0 %vm153_vm4, %v1236_v17 }
 0x97c   :  { %2095 = vmatpush3.msra.mxu0 %v2465_v10  ;;  %2110 = vmatprep.mubr.msk.f32.mxu0 %vm2143_vm2, %v2142_v0 }
 0x97d   :  { %2096 = vmatprep.subr.mxu0 %v2142_v0 }
 0x97e   :  { %2097 = vmatpush3.msra.mxu0 %v2475_v12 }
 0x97f   :  { %2098 = vmatprep.subr.mxu0 %v2142_v0 }
 0x980   :  { %2099 = vmatpush3.msra.mxu0 %v2485_v14 }
 0x981   :  { %2100 = vmatprep.subr.mxu0 %v2142_v0 }
 0x982   :  { %2101 = vmatpush3.msra.mxu0 %v2495_v16 }
 0x983   :  { %2102 = vmatprep.subr.mxu0 %v2142_v0 }
 0x984   :  { %2103 = vmatpush3.msra.mxu0 %v2505_v18 }
 0x985   :  { %2104 = vmatprep.subr.mxu0 %v2142_v0 }
 0x986   :  { %2105 = vmatpush3.msra.mxu0 %v2514_v20 }
 0x987   :  { %2106 = vmatprep.subr.mxu0 %v2142_v0 }
 0x988   :  { %2107 = vmatpush3.msra.mxu0 %v2522_v21 }
 0x989   :  { %2108 = vmatprep.subr.mxu0 %v2142_v0 }
 0x98a   :  { %2109 = vmatpush3.msra.mxu0 %v2528_v23 }
 0xa3b   :  { %v1305_v19 = vpop.f32.mrf.mxu0 }
 0xa3c   :  { %v1309_v24 = vadd.f32 %v1305_v19, %v2601_v56 }
 0xa3d   :  { %v2074_v25 = vpop.f32.mrf.mxu0 }
 0xa3e   :  { %v1310_v26 = vmax.f32 %v1309_v24, 0.0 }
 0xa40   :  { %2092 = vmatmul.mubr.msk.f32.vlgmr.msra.gmra.mxu1 %vm153_vm4, %v1310_v26  ;;  %v1561_v29 = vsel %vm141_vm3, %v1310_v26, %v1236_v17  ;;  %v1557_v45 = vrot.slane %v1310_v26, 2 }
 0xa41   :  { %2114 = vmatpush3.msra.mxu1 %v2465_v10  ;;  %2129 = vmatprep.mubr.msk.f32.mxu1 %vm2143_vm2, %v2142_v0 }
 0xa42   :  { %2115 = vmatprep.subr.mxu1 %v2142_v0  ;;  %v1559_v52 = vsel %vm141_vm3, %v1234_v15, %v1557_v45 }
 0xa43   :  { %2116 = vmatpush3.msra.mxu1 %v2475_v12 }
 0xa44   :  { %2117 = vmatprep.subr.mxu1 %v2142_v0 }
 0xa45   :  { %2118 = vmatpush3.msra.mxu1 %v2485_v14 }
 0xa46   :  { %2119 = vmatprep.subr.mxu1 %v2142_v0 }
 0xa47   :  { %2120 = vmatpush3.msra.mxu1 %v2495_v16 }
 0xa48   :  { %2121 = vmatprep.subr.mxu1 %v2142_v0 }
 0xa49   :  { %2122 = vmatpush3.msra.mxu1 %v2505_v18 }
 0xa4a   :  { %2123 = vmatprep.subr.mxu1 %v2142_v0 }
 0xa4b   :  { %2124 = vmatpush3.msra.mxu1 %v2514_v20 }
 0xa4c   :  { %2125 = vmatprep.subr.mxu1 %v2142_v0 }
 0xa4d   :  { %2126 = vmatpush3.msra.mxu1 %v2522_v21 }
 0xa4e   :  { %2127 = vmatprep.subr.mxu1 %v2142_v0 }
 0xa4f   :  { %2128 = vmatpush3.msra.mxu1 %v2528_v23 }
 0xb00   :  { %v1380_v10 = vpop.f32.mrf.mxu1 }
 0xb01   :  { %v1385_v12 = vrot.slane %v1380_v10, 6 }
 0xb02   :  { %v2093_v14 = vpop.f32.mrf.mxu1 }
 0xb03   :  { %v1387_v16 = vadd.f32 %v1385_v12, %v2604_v57 }
 0xb05   :  { %v1388_v18 = vmax.f32 %v1387_v16, 0.0 }
 0xb07   :  { %v1390_v30 = vrot.slane %v1388_v18, 2  ;;  %v1564_v20 = vsel %vm141_vm3, %v1388_v18, %v1562_v27  ;;  %v1554_v39 = vrot.slane %v1388_v18, 6 }
 0xb08   :  { %v1574_v31 = vsel %vm801_vm5, %v1561_v29, %v1564_v20 }
 0xb09   :  { %2111 = vmatmul.mubr.msk.f32.vlgmr.msra.gmra.mxu0 %vm153_vm4, %v1390_v30  ;;  %v1556_v50 = vsel %vm141_vm3, %v2651_v6, %v1554_v39 }
 0xbc9   :  { %v1459_v0 = vpop.f32.mrf.mxu0 }
 0xbca   :  { %v1464_v21 = vrot.slane %v1459_v0, 4 }
 0xbcb   :  { %v2112_v23 = vpop.f32.mrf.mxu0 }
 0xbcc   :  { %v1466_v32 = vadd.f32 %v1464_v21, %v2601_v56 }
 0xbce   :  { %v1467_v35 = vmax.f32 %v1466_v32, 0.0 }
 0xbd0   :  { %v1469_v36 = vrot.slane %v1467_v35, 4  ;;  %v1567_v37 = vsel %vm141_vm3, %v1467_v35, %v1565_v34  ;;  %v1551_v28 = vrot.slane %v1467_v35, 2 }
 0xbd1   :  { %v1575_v38 = vsel %vm59_vm0, %v1574_v31, %v1567_v37 }
 0xbd2   :  { %2130 = vmatmul.mubr.msk.f32.vlgmr.msra.gmra.mxu1 %vm153_vm4, %v1469_v36  ;;  %v1553_v48 = vsel %vm141_vm3, %v2629_v63, %v1551_v28 }
 0xc92   :  { %v1538_v40 = vpop.f32.mrf.mxu1 }
 0xc93   :  { %v1543_v41 = vrot.slane %v1538_v40, 2 }
 0xc94   :  { %v2131_v42 = vpop.f32.mrf.mxu1 }
 0xc95   :  { %v1545_v43 = vadd.f32 %v1543_v41, %v2604_v57 }
 0xc97   :  { %v1546_v33 = vmax.f32 %v1545_v43, 0.0 }
 0xc99   :  { %v1548_v46 = vrot.slane %v1546_v33, 6  ;;  %v1570_v49 = vsel %vm141_vm3, %v1546_v33, %v1568_v44 }
 0xc9a   :  { %v1576_v56 = vsel %vm804_vm6, %v1575_v38, %v1570_v49 }
 0xc9b   :  { %v1550_v47 = vsel %vm141_vm3, %v2606_v58, %v1548_v46  ;;  %v1585_v59 = vmul.f32 %v1645_v55, %v1576_v56 }
 0xc9c   :  { %v1571_v51 = vsel %vm801_vm5, %v1550_v47, %v1553_v48 }
 0xc9d   :  { %v1572_v53 = vsel %vm59_vm0, %v1571_v51, %v1556_v50  ;;  %v1589_v60 = vsel %vm153_vm4, %v1585_v59, 0.0 }
 0xc9e   :  { %v1573_v54 = vsel %vm804_vm6, %v1572_v53, %v1559_v52 }
 0xc9f   :  { %v1584_v57 = vmul.f32 %v1645_v55, %v1573_v54 }
 0xca1   :  { %v1586_v58 = vsel %vm153_vm4, %v1584_v57, 0.0 }
 0xca2   :  { %1587 = vadd.xlane.f32.xlu0 %v1586_v58 }
 0xca6   :  { %1590 = vadd.xlane.f32.xlu0 %v1589_v60 }
 0xd2b   :  { %v1588_v62 = vpop.xlane.xlu0 %1587 }
 0xd2c   :  { %v1599_v63 = vadd.f32 %v1646_v61, %v1588_v62 }
 0xd2e   :  { %v1601_v1 = vsub.f32 0.0, %v1599_v63 }
 0xd2f   :  { %v1591_v2 = vpop.xlane.xlu0 %1590 }
 0xd30   :  { %v1603_v3 = vmul.f32 1.442695, %v1601_v1  ;;  %v1600_v4 = vadd.f32 %v1646_v61, %v1591_v2 }
 0xd32   :  { %2134 = vpow2.f32 %v1603_v3  ;;  %v1602_v5 = vsub.f32 0.0, %v1600_v4 }
 0xd34   :  { %v1605_v6 = vmul.f32 1.442695, %v1602_v5 }
 0xd36   :  { %2136 = vpow2.f32 %v1605_v6 }
 0xd3f   :  { %v2135_v7 = vpop.eup %2134 }
 0xd40   :  { %v1607_v8 = vadd.f32 1.0, %v2135_v7 }
 0xd42   :  { %2138 = vrcp.f32 %v1607_v8 }
 0xd43   :  { %v2137_v9 = vpop.eup %2136 }
 0xd44   :  { %v1608_v11 = vadd.f32 1.0, %v2137_v9 }
 0xd46   :  { %2140 = vrcp.f32 %v1608_v11 }
 0xd4f   :  { %v2139_v13 = vpop.eup %2138 }
 0xd50   :  { %vm1613_vm8 = vcmp.ne.f32.partialorder %v2139_v13, %v2139_v13 }
 0xd51   :  { %v1615_v15 = vsel %vm1613_vm8, 0.0, %v2139_v13 }
 0xd52   :  { %1618 = vst.msk [vmem:[%s2766_s9] sm:$0xff] %vm1617_vm7, %v1615_v15 }
 0xd53   :  { %v2141_v17 = vpop.eup %2140 }
 0xd54   :  { %vm1614_vm9 = vcmp.ne.f32.partialorder %v2141_v17, %v2141_v17 }
 0xd55   :  { %v1616_v19 = vsel %vm1614_vm9, 0.0, %v2141_v17 }
 0xd56   :  { %1619 = vst.msk [vmem:[%s2766_s9 + $0x8] sm:$0xff] %vm1617_vm7, %v1616_v19 }

</bundles_post_ra>
